<compile_context>
chip_gen: v7x
topology: tpu7x:2x2x1
jax: 0.10.0
libtpu: 0.0.40
codegen_flags: <defaults>
</compile_context>

<pallas_src>
import functools
import math

import jax
import jax.numpy as jnp
from jax.experimental import pallas as pl
from jax.experimental.pallas import tpu as pltpu


def _softmax_1xk(p):
    """Numerically-stable softmax of a (1, k) f32 tile."""
    m = jnp.max(p, axis=-1, keepdims=True)       # lane reduction (XLU)
    e = jnp.exp(p - m)                           # EUP exp
    s = jnp.sum(e, axis=-1, keepdims=True)       # lane reduction (XLU)
    # Exact divide: keep the 1e-6 tolerance; pl.reciprocal(approx=True) would
    # introduce ~1e-3 rel error for negligible gain at k=10.
    return e / s


def _leaf_dist_kernel(p_ref, o_ref):
    # p_ref / o_ref: (1, k).  Row replication happens in the wrapper.
    o_ref[...] = _softmax_1xk(p_ref[...]).astype(o_ref.dtype)


def _leaf_flat_kernel(p_ref, o_ref, *, reps):
    # p_ref: (1, L) = raw dist_params lane-tiled `reps` times (L = reps*k,
    #        L % 128 == 0), resident across all grid steps (constant index_map).
    # o_ref: (tile_rows, L) lane-dense output block.
    #
    # softmax(tiled(x)) == tiled(softmax(x)) / reps, so scaling by `reps`
    # recovers the exact per-class distribution in every k-wide lane segment
    # with no in-kernel gather / reshape / cross-lane relayout.
    p = p_ref[...]
    m = jnp.max(p, axis=-1, keepdims=True)
    e = jnp.exp(p - m)
    s = jnp.sum(e, axis=-1, keepdims=True)
    slab = (e * (float(reps) / s)).astype(o_ref.dtype)       # (1, L), one vreg row
    # Sublane broadcast -> full-lane, unmasked stores over the whole block.
    o_ref[...] = jnp.broadcast_to(slab, o_ref.shape)


def leaf_forward(xs: jax.Array, dist_params: jax.Array, *,
                 materialize: bool = False,
                 out_dtype=jnp.float32,
                 target_block_bytes: int = 4 * 1024 * 1024) -> jax.Array:
    """Pallas equivalent of Leaf.forward(xs): (bs, k) identical softmax rows.

    materialize=False (default): Pallas emits only the (1, k) softmax; XLA
        broadcasts the rows (no redundant kernel HBM writeback).
    materialize=True: the kernel writes the full output itself using a
        lane-dense flat layout (lcm(k, 128) lanes per flat row).
    """
    bs = xs.shape[0]
    k = dist_params.shape[0]
    p2 = dist_params.reshape(1, k).astype(jnp.float32)

    if not materialize:
        dist = pl.pallas_call(
            _leaf_dist_kernel,
            out_shape=jax.ShapeDtypeStruct((1, k), jnp.float32),
            in_specs=[pl.BlockSpec((1, k), lambda: (0, 0))],
            out_specs=pl.BlockSpec((1, k), lambda: (0, 0)),
        )(p2)
        return jnp.broadcast_to(dist.astype(out_dtype), (bs, k))

    # ---------------- materialized, lane-dense path ----------------
    lane_width = (k * 128) // math.gcd(k, 128)   # lcm(k, 128); 640 for k=10
    reps = lane_width // k                       # logical rows per flat row
    total = bs * k
    flat_rows = pl.cdiv(total, lane_width)
    padded = (flat_rows * lane_width) != total   # only when bs*k % lcm != 0

    itemsize = jnp.dtype(out_dtype).itemsize
    ALIGN = 16                                    # safe sublane mult. for f32/bf16
    max_rows = max(1, target_block_bytes // (lane_width * itemsize))
    if flat_rows <= max_rows:
        tile_rows = flat_rows                     # single full-extent block
    else:
        tile_rows = max(ALIGN, (max_rows // ALIGN) * ALIGN)
        if tile_rows >= flat_rows:
            tile_rows = flat_rows
    nb = pl.cdiv(flat_rows, tile_rows)            # ragged last block is masked

    # Lane-tile the raw params once in the wrapper (640 floats of layout
    # plumbing, not compute hoisting); the softmax itself stays in the kernel.
    p_tiled = jnp.tile(p2, (1, reps))

    out = pl.pallas_call(
        functools.partial(_leaf_flat_kernel, reps=reps),
        out_shape=jax.ShapeDtypeStruct((flat_rows, lane_width), out_dtype),
        grid=(nb,),
        in_specs=[pl.BlockSpec((1, lane_width), lambda i: (0, 0))],   # resident
        out_specs=pl.BlockSpec((tile_rows, lane_width), lambda i: (i, 0)),
        compiler_params=pltpu.CompilerParams(
            dimension_semantics=("parallel",),
        ),
    )(p_tiled)

    if padded:
        # TODO(synk): ragged bs (bs*k % lcm(k,128) != 0) still costs one XLA
        # tail-trim copy; typical SDT batch sizes (multiples of 64 at k=10)
        # take the zero-copy branch below.
        return out.reshape(-1)[:total].reshape(bs, k)
    # Contiguous row-major: pure metadata reshape, no HBM traffic.
    return out.reshape(bs, k)


if __name__ == "__main__":
    key = jax.random.PRNGKey(0)
    k_params, k_x = jax.random.split(key)

    k = 10
    w = h = 16
    # Deterministic "torch.randn(k)" analogue for the leaf parameters.
    dist_params = jax.random.normal(k_params, (k,), dtype=jnp.float32)
    ref_row = jax.nn.softmax(dist_params)

    def check(bs, out, atol=1e-6):
        assert out.shape == (bs, k), out.shape
        ref = jnp.broadcast_to(ref_row[None, :], (bs, k))
        assert jnp.allclose(out.astype(jnp.float32), ref, atol=atol), \
            f"mismatch vs reference softmax at bs={bs}"

    # Default path: Pallas (1, k) softmax + wrapper broadcast (module shapes).
    bs = 2
    xs = jax.random.normal(k_x, (bs, w * h), dtype=jnp.float32)
    out = jax.block_until_ready(leaf_forward(xs, dist_params))
    check(bs, out)

    # Materialized lane-dense path, ragged bs (bs*k not a multiple of 640).
    for bs2 in (2, 50):
        xs2 = jnp.zeros((bs2, w * h), dtype=jnp.float32)
        out2 = jax.block_until_ready(
            leaf_forward(xs2, dist_params, materialize=True))
        check(bs2, out2)

    # Zero-copy path (bs % 64 == 0), multiple grid steps + ragged last block.
    bs3 = 8320
    xs3 = jnp.zeros((bs3, w * h), dtype=jnp.float32)
    out3 = jax.block_until_ready(
        leaf_forward(xs3, dist_params, materialize=True,
                     target_block_bytes=32 * 640 * 4))
    check(bs3, out3)

    # bf16 writeback (halves HBM bytes on the writeback-bound path).
    bs4 = 128
    xs4 = jnp.zeros((bs4, w * h), dtype=jnp.float32)
    out4 = jax.block_until_ready(
        leaf_forward(xs4, dist_params, materialize=True,
                     out_dtype=jnp.bfloat16))
    check(bs4, out4, atol=1e-2)

    print("KERNEL_OK")
</pallas_src>

<mosaic_0001>
module attributes {stable_mosaic.version = 11 : i64} {
  func.func @_leaf_dist_kernel(%arg0: memref<1x10xf32, #tpu.memory_space<vmem>>, %arg1: memref<1x10xf32, #tpu.memory_space<vmem>>) attributes {dimension_semantics = [], scalar_prefetch = 0 : i64, scratch_operands = 0 : i64, tpu.core_type = #tpu.core_type<tc>} {
    %c0 = arith.constant 0 : index
    %c0_0 = arith.constant 0 : index
    %0 = vector.load %arg0[%c0, %c0_0] : memref<1x10xf32, #tpu.memory_space<vmem>>, vector<1x10xf32>
    %cst = arith.constant dense<0xFF800000> : vector<1xf32>
    %1 = vector.multi_reduction <maximumf>, %0, %cst [1] : vector<1x10xf32> to vector<1xf32>
    %2 = vector.shape_cast %1 : vector<1xf32> to vector<1x1xf32>
    %3 = vector.broadcast %2 : vector<1x1xf32> to vector<1x10xf32>
    %4 = arith.subf %0, %3 : vector<1x10xf32>
    %5 = math.exp %4 : vector<1x10xf32>
    %cst_1 = arith.constant dense<0.000000e+00> : vector<1xf32>
    %6 = vector.multi_reduction <add>, %5, %cst_1 [1] : vector<1x10xf32> to vector<1xf32>
    %7 = vector.shape_cast %6 : vector<1xf32> to vector<1x1xf32>
    %8 = vector.broadcast %7 : vector<1x1xf32> to vector<1x10xf32>
    %9 = arith.divf %5, %8 : vector<1x10xf32>
    %c0_2 = arith.constant 0 : index
    %c0_3 = arith.constant 0 : index
    %10 = vector.load %arg1[%c0_2, %c0_3] : memref<1x10xf32, #tpu.memory_space<vmem>>, vector<1x10xf32>
    tpu.vector_store %arg1[%c0_2, %c0_3], %9 {strides = array<i32>} : memref<1x10xf32, #tpu.memory_space<vmem>>, vector<1x10xf32>,
    return
  }
}

</mosaic_0001>

<bundles_post_ra>
// kernel: tpu_custom_call.1
= control target key start
LH: loop header
LB: loop body
LE: loop exit
PB: predicated region body
PF: predicated region fallthrough
CT: control target
= control target key end

     0   :  { %6 = vsyncpa [#allocation3], 0  ;;  %s143_s0 = inlined_call_operand.hbm [shape: f32[1,10], index: 0, kind: input, shape index: {}]   ;;  %s144_s1 = inlined_call_operand.hbm [shape: f32[1,10], index: 1, kind: output, shape index: {}]  }
   0x1   :  { %7 = vsyncpa [#allocation4], 0  ;;  %s104_s6 = smov [#allocation2]   ;;  %s56_s10 = scalar_lea.hbm %s143_s0, 16 }
   0x2   :  { %s14_s7 = sshll.u32 %s104_s6, 4  ;;  %p57_p0 = scmp.ne.s32.totalorder %s143_s0, %s56_s10  ;;  %s15_s7 = int_to_ptr.vmem [resolvable:$true] %s14_s7 }
   0x3   :  { %p60_p1 = scmp.lt.u32.totalorder %s56_s10, %s143_s0 }
   0x5   :  { %p62_p2 = pnand %p60_p1, %p57_p0 }
   0x7   :  { %65 = shalt.err (!%p62_p2)
}
   0x8   :  { %s66_s15 = scalar_lea.vmem %s15_s7, 16  ;;  %s70_s16 = scalar_lea.vmem %s15_s7, 32 }
   0x9   :  { %p67_p3 = scmp.ne.s32.totalorder %s15_s7, %s66_s15  ;;  %p71_p4 = scmp.lt.s32.totalorder %s15_s7, %s15_s7 }
   0xa   :  { %p72_p5 = scmp.lt.s32.totalorder %s70_s16, %s66_s15 }
   0xc   :  { %p73_p6 = por %p72_p5, %p71_p4 }
   0xe   :  { %p74_p7 = pnand %p73_p6, %p67_p3 }
  0x10   :  { %77 = shalt.err (!%p74_p7)
}
  0x11   :  { %17 = dma.hbm_to_vmem [thread:$0]  %s143_s0, 16, %s15_s7, [#allocation3]  }
  0x12   :  { %100 = dma.done.wait [#allocation3], 16  }
  0x13   :  { %101 = vsyncadd [#allocation3], 4294967280  ;;  %vm22_vm0 = vcmask 73728   ;;  %v21_v0 = vld [vmem:[#allocation2] sm:$0x1]  ;;  %s105_s19 = smov [#allocation5]  }
  0x14   :  { %v23_v1 = vsel %vm22_vm0, %v21_v0, -inf  ;;  %s41_s20 = sshll.u32 %s105_s19, 4  ;;  %s42_s20 = int_to_ptr.vmem [resolvable:$true] %s41_s20 }
  0x15   :  { %24 = vmax.xlane.f32.xlu0 %v23_v1  ;;  %s78_s0 = scalar_lea.vmem %s42_s20, 16  ;;  %s82_s21 = scalar_lea.vmem %s42_s20, 32 }
  0x16   :  { %p79_p8 = scmp.ne.s32.totalorder %s42_s20, %s78_s0  ;;  %p83_p9 = scmp.lt.s32.totalorder %s42_s20, %s42_s20 }
  0x17   :  { %p84_p10 = scmp.lt.s32.totalorder %s82_s21, %s78_s0 }
  0x19   :  { %p85_p11 = por %p84_p10, %p83_p9 }
  0x1b   :  { %p86_p12 = pnand %p85_p11, %p79_p8 }
  0xa2   :  { %v25_v2 = vpop.xlane.xlu0 %24 }
  0xa3   :  { %v26_v3 = vsub.f32 %v21_v0, %v25_v2 }
  0xa5   :  { %v27_v4 = vmul.f32 1.442695, %v26_v3 }
  0xa7   :  { %52 = vpow2.f32 %v27_v4 }
  0xb1   :  { %v53_v5 = vpop.eup %52 }
  0xb2   :  { %v29_v6 = vsel %vm22_vm0, %v53_v5, 0.0 }
  0xb3   :  { %30 = vadd.xlane.f32.xlu0 %v29_v6 }
 0x140   :  { %v31_v7 = vpop.xlane.xlu0 %30 }
 0x141   :  { %54 = vrcp.f32 %v31_v7 }
 0x14b   :  { %v55_v8 = vpop.eup %54 }
 0x14c   :  { %v33_v9 = vmul.f32 %v55_v8, %v53_v5 }
 0x14e   :  { %34 = vst.msk [vmem:[#allocation5] sm:$0x1] %vm22_vm0, %v33_v9 }
 0x14f   :  { %89 = shalt.err (!%p86_p12)
}
 0x150   :  { %s90_s24 = scalar_lea.hbm %s144_s1, 16 }
 0x151   :  { %p91_p13 = scmp.ne.s32.totalorder %s144_s1, %s90_s24  ;;  %p94_p0 = scmp.lt.u32.totalorder %s90_s24, %s144_s1 }
 0x153   :  { %p96_p1 = pnand %p94_p0, %p91_p13 }
 0x155   :  { %99 = shalt.err (!%p96_p1)
}
 0x156   :  { %44 = dma.vmem_to_hbm [thread:$0]  %s42_s20, 16, %s144_s1, [#allocation4]  }
 0x157   :  { %102 = dma.done.wait [#allocation4], 16  }
 0x158   :  { %103 = vsyncadd [#allocation4], 4294967280 }
 0x159   :  { %48 = vsyncpa [#allocation3], 1 }
 0x15a   :  { %49 = vsyncpa [#allocation4], 1 }

</bundles_post_ra>
